<compile_context>
chip_gen: v6e
topology: v6e:2x2x1
jax: 0.10.0
libtpu: 0.0.40
codegen_flags: <defaults>
</compile_context>

<pallas_src>
import jax
import jax.numpy as jnp
from jax.experimental import pallas as pl
from jax.experimental.pallas import tpu as pltpu

_MAX_DMA_CHUNKS = 4            # concurrent DMA descriptors for large inputs
_MIN_CHUNK_BYTES = 1 << 20     # only split once each descriptor moves >= 1 MiB


def _make_copy_kernel(chunks: int):
    """Kernel: issue `chunks` HBM->HBM DMAs (start all, then wait all)."""

    def kernel(x_hbm, o_hbm, sem):
        copies = [
            pltpu.make_async_copy(x_hbm.at[i], o_hbm.at[i], sem.at[i])
            for i in range(chunks)
        ]
        for c in copies:
            c.start()
        for c in copies:
            c.wait()

    return kernel


def _pick_chunks(n_elems: int, itemsize: int) -> int:
    """Number of concurrent DMA descriptors: 4, 2, or 1 (must divide n_elems)."""
    total_bytes = n_elems * itemsize
    for c in (_MAX_DMA_CHUNKS, 2):
        if n_elems % c == 0 and total_bytes // c >= _MIN_CHUNK_BYTES:
            return c
    return 1


def nop_layer_forward(x: jax.Array) -> jax.Array:
    """Identity forward pass (NopLayer.forward) via a direct HBM->HBM Pallas DMA copy."""
    if x.size == 0:
        return x  # nothing to copy

    orig_shape = x.shape
    n = x.size
    itemsize = jnp.dtype(x.dtype).itemsize
    chunks = _pick_chunks(n, itemsize)

    # Free metadata reshape for contiguous row-major inputs (guaranteed inside jit).
    x2d = x.reshape(chunks, n // chunks)

    out2d = pl.pallas_call(
        _make_copy_kernel(chunks),
        out_shape=jax.ShapeDtypeStruct((chunks, n // chunks), x.dtype),
        in_specs=[pl.BlockSpec(memory_space=pl.ANY)],    # raw HBM ref, no auto-DMA
        out_specs=pl.BlockSpec(memory_space=pl.ANY),     # raw HBM ref, written by DMA
        scratch_shapes=[pltpu.SemaphoreType.DMA((chunks,))],
        cost_estimate=pl.CostEstimate(
            flops=0,
            transcendentals=0,
            bytes_accessed=2 * n * itemsize),
    )(x2d)

    return out2d.reshape(orig_shape)


class NopLayer:
    """JAX/Pallas port of pathwayae.models.common.NopLayer (no parameters)."""

    def __init__(self, *args, **kwargs):
        pass

    def __call__(self, x: jax.Array) -> jax.Array:
        return nop_layer_forward(x)

    def update_temperature(self, *args, **kwargs) -> None:
        pass

    def layer_activations(self, *args, **kwargs) -> list:
        return []


if __name__ == "__main__":
    key = jax.random.PRNGKey(0)
    k0, k1, k2, k3 = jax.random.split(key, 4)

    layer = NopLayer()

    # Small NCHW example consistent with typical conv-style inputs.
    x = jax.random.normal(k0, (2, 4, 16, 16), dtype=jnp.float32)
    y = layer(x)
    jax.block_until_ready(y)
    assert y.shape == x.shape and y.dtype == x.dtype
    assert bool(jnp.all(y == x))

    # bf16 path (dtype-agnostic: DMA is byte-addressed).
    xb = jax.random.normal(k1, (4, 16, 128), dtype=jnp.bfloat16)
    yb = nop_layer_forward(xb)
    jax.block_until_ready(yb)
    assert yb.shape == xb.shape and yb.dtype == xb.dtype
    assert bool(jnp.all(yb == xb))

    # Odd, non-128-divisible shape: same single-descriptor DMA path, no masked stores.
    xo = jax.random.normal(k2, (3, 5, 7), dtype=jnp.float32)
    yo = nop_layer_forward(xo)
    jax.block_until_ready(yo)
    assert yo.shape == xo.shape and bool(jnp.all(yo == xo))

    # Larger (4 MiB) input exercising the 4-descriptor concurrent-DMA path.
    xl = jax.random.normal(k3, (4, 256, 1024), dtype=jnp.float32)
    yl = nop_layer_forward(xl)
    jax.block_until_ready(yl)
    assert yl.shape == xl.shape and bool(jnp.all(yl == xl))

    assert layer.layer_activations() == []
    layer.update_temperature(1.0)

    print("KERNEL_OK")
</pallas_src>

<mosaic_0001>
module attributes {stable_mosaic.version = 11 : i64} {
  func.func @kernel(%arg0: memref<1x2048xf32, #tpu.memory_space<any>>, %arg1: memref<1x2048xf32, #tpu.memory_space<any>>, %arg2: memref<1x!tpu.dma_semaphore, #tpu.memory_space<semaphore_mem>>) attributes {dimension_semantics = [], scalar_prefetch = 0 : i64, scratch_operands = 1 : i64, tpu.core_type = #tpu.core_type<tc>} {
    %c0_i32 = arith.constant 0 : i32
    %c0_i32_0 = arith.constant 0 : i32
    %c0_i32_1 = arith.constant 0 : i32
    %c0_i32_2 = arith.constant 0 : i32
    %0 = tpu.memref_slice %arg0[%c0_i32, %c0_i32_2] : memref<1x2048xf32, #tpu.memory_space<any>> -> memref<1x2048xf32, #tpu.memory_space<any>>
    %1 = tpu.memref_squeeze %0 : memref<1x2048xf32, #tpu.memory_space<any>> -> memref<2048xf32, #tpu.memory_space<any>>
    %c0_i32_3 = arith.constant 0 : i32
    %2 = tpu.memref_slice %arg1[%c0_i32_0, %c0_i32_3] : memref<1x2048xf32, #tpu.memory_space<any>> -> memref<1x2048xf32, #tpu.memory_space<any>>
    %3 = tpu.memref_squeeze %2 : memref<1x2048xf32, #tpu.memory_space<any>> -> memref<2048xf32, #tpu.memory_space<any>>
    %4 = tpu.memref_slice %arg2[%c0_i32_1] : memref<1x!tpu.dma_semaphore, #tpu.memory_space<semaphore_mem>> -> memref<1x!tpu.dma_semaphore, #tpu.memory_space<semaphore_mem>>
    %5 = tpu.memref_squeeze %4 : memref<1x!tpu.dma_semaphore, #tpu.memory_space<semaphore_mem>> -> memref<!tpu.dma_semaphore, #tpu.memory_space<semaphore_mem>>
    tpu.enqueue_dma source(%1 : memref<2048xf32, #tpu.memory_space<any>>) target(%3 : memref<2048xf32, #tpu.memory_space<any>>) target_semaphore(%5 : memref<!tpu.dma_semaphore, #tpu.memory_space<semaphore_mem>>)
    %c0_i32_4 = arith.constant 0 : i32
    %c0_i32_5 = arith.constant 0 : i32
    %c0_i32_6 = arith.constant 0 : i32
    %c0_i32_7 = arith.constant 0 : i32
    %6 = tpu.memref_slice %arg0[%c0_i32_4, %c0_i32_7] : memref<1x2048xf32, #tpu.memory_space<any>> -> memref<1x2048xf32, #tpu.memory_space<any>>
    %7 = tpu.memref_squeeze %6 : memref<1x2048xf32, #tpu.memory_space<any>> -> memref<2048xf32, #tpu.memory_space<any>>
    %c0_i32_8 = arith.constant 0 : i32
    %8 = tpu.memref_slice %arg1[%c0_i32_5, %c0_i32_8] : memref<1x2048xf32, #tpu.memory_space<any>> -> memref<1x2048xf32, #tpu.memory_space<any>>
    %9 = tpu.memref_squeeze %8 : memref<1x2048xf32, #tpu.memory_space<any>> -> memref<2048xf32, #tpu.memory_space<any>>
    %10 = tpu.memref_slice %arg2[%c0_i32_6] : memref<1x!tpu.dma_semaphore, #tpu.memory_space<semaphore_mem>> -> memref<1x!tpu.dma_semaphore, #tpu.memory_space<semaphore_mem>>
    %11 = tpu.memref_squeeze %10 : memref<1x!tpu.dma_semaphore, #tpu.memory_space<semaphore_mem>> -> memref<!tpu.dma_semaphore, #tpu.memory_space<semaphore_mem>>
    tpu.wait_dma2 semaphore(%11 : memref<!tpu.dma_semaphore, #tpu.memory_space<semaphore_mem>>) src(%7 : memref<2048xf32, #tpu.memory_space<any>>) dst(%9 : memref<2048xf32, #tpu.memory_space<any>>)
    return
  }
}

</mosaic_0001>

<bundles_post_ra>
// kernel: tpu_custom_call.1
= control target key start
LH: loop header
LB: loop body
LE: loop exit
PB: predicated region body
PF: predicated region fallthrough
CT: control target
= control target key end

     0   :  { %s27_s6 = smov [#allocation2]   ;;  %s28_s7 = smov 131072   ;;  %s46_s0 = inlined_call_operand.hbm [shape: f32[1,2048], index: 0, kind: input, shape index: {}]   ;;  %s47_s1 = inlined_call_operand.hbm [shape: f32[1,2048], index: 1, kind: output, shape index: {}]  }
   0x1   :  { %s29_s8 = smov 0  }
   0x2   :  { %12 = dma.general %s46_s0, 256, %s47_s1, %s27_s6, %s28_s7, [#allocation4], %s29_s8, 0  }
   0x3   :  { %25 = dma.done.wait [#allocation2], 256 }
   0x4   :  { %26 = vsyncadd [#allocation2], 4294967040 }
   0x5   :  { %15 = vsyncmov [#allocation2] }
   0x8   :  { %s16_s13 = vpop.sfrf %15 }
   0x9   :  { %p21_p0 = scmp.ne.s32.totalorder %s16_s13, 0 }
   0xb   :  { %20 = shalt.err (%p21_p0)  }

</bundles_post_ra>
